<compile_context>
chip_gen: v7x
topology: tpu7x:2x2x1
jax: 0.10.0
libtpu: 0.0.40
codegen_flags: <defaults>
</compile_context>

<pallas_src>
import math

import jax
import jax.numpy as jnp
import numpy as np
from jax.experimental import pallas as pl
from jax.experimental.pallas import tpu as pltpu


# ----------------------------------------------------------------------------
# Deterministic parameter init: replicate
#   sigma  = 0.3 * ((k - 1) * 0.5 - 1) + 0.8
#   kernel = scipy.ndimage.gaussian_filter(delta, sigma)   (truncate=4, reflect)
# in pure numpy (no scipy dependency).
# ----------------------------------------------------------------------------
def _gaussian_kernel1d(sigma, radius):
    x = np.arange(-radius, radius + 1, dtype=np.float64)
    phi = np.exp(-0.5 / (sigma * sigma) * x * x)
    return phi / phi.sum()


def gaussian_taps_1d(kernel_size):
    """1-D taps v such that the scipy 2-D kernel == outer(v, v) exactly."""
    sigma = 0.3 * ((kernel_size - 1) * 0.5 - 1) + 0.8
    radius = int(4.0 * sigma + 0.5)  # scipy default truncate=4.0
    w1d = _gaussian_kernel1d(sigma, radius)
    delta = np.zeros(kernel_size, dtype=np.float64)
    delta[kernel_size // 2] = 1.0
    padded = np.pad(delta, radius, mode="symmetric")  # scipy 'reflect' == np 'symmetric'
    v = np.convolve(padded, w1d, mode="valid")        # w1d symmetric -> conv == corr
    assert v.shape == (kernel_size,)
    return v


def gaussian_blur_weight(kernel_size):
    """Full 2-D construction (for cross-checking the separable decomposition)."""
    sigma = 0.3 * ((kernel_size - 1) * 0.5 - 1) + 0.8
    radius = int(4.0 * sigma + 0.5)
    w1d = _gaussian_kernel1d(sigma, radius)
    out = np.zeros((kernel_size, kernel_size), dtype=np.float64)
    c = kernel_size // 2
    out[c, c] = 1.0
    for axis in (0, 1):
        pad = [(radius, radius) if a == axis else (0, 0) for a in range(2)]
        padded = np.pad(out, pad, mode="symmetric")
        out = np.apply_along_axis(
            lambda m: np.convolve(m, w1d, mode="valid"), axis, padded
        )
    return out.astype(np.float32)


# ----------------------------------------------------------------------------
# In-kernel helpers (trace-time Python, compile-time tap constants).
# ----------------------------------------------------------------------------
def _round_up(x, m):
    return ((x + m - 1) // m) * m


def _accumulate(terms, max_partials=4):
    """Sum a list of slabs with at most `max_partials` live partial accumulators
    (enough to fill the 4 VALU slots without inflating VMEM live ranges)."""
    terms = list(terms)
    n_acc = max(1, min(max_partials, len(terms)))
    acc = terms[:n_acc]
    for i in range(n_acc, len(terms)):
        acc[i % n_acc] = acc[i % n_acc] + terms[i]
    total = acc[0]
    for a in acc[1:]:
        total = total + a
    return total


def _sym_tap_terms(shift, k, taps):
    """Gaussian taps are symmetric: pair slice t with slice k-1-t before the
    multiply -> ceil(k/2) multiplies per pass instead of k."""
    p = k // 2
    terms = [taps[t] * (shift(t) + shift(k - 1 - t)) for t in range(p)]
    terms.append(taps[p] * shift(p))
    return terms


def _w_pass(tmp, k, taps, W, Wp, p):
    """Reflect-pad + k-tap blur along W (lane axis) on the true W columns;
    re-pad with zeros to the lane-dense width Wp before the (unmasked) store."""
    core = tmp[:, :, :W] if Wp != W else tmp
    left = [core[:, :, j:j + 1] for j in range(p, 0, -1)]
    right = [core[:, :, W - 1 - j:W - j] for j in range(1, p + 1)]
    tpad = jnp.concatenate(left + [core] + right, axis=2)      # (..., W + 2p)
    out = _accumulate(_sym_tap_terms(lambda t: tpad[:, :, t:t + W], k, taps))
    if Wp != W:
        out = jnp.concatenate(
            [out, jnp.zeros(out.shape[:2] + (Wp - W,), out.dtype)], axis=2)
    return out


def _make_fused_kernel(k, taps, H, W, Wp):
    """Whole image resident per grid step; reflection halo built in VMEM."""
    p = k // 2

    def kernel(x_ref, o_ref):
        xb = x_ref[...].astype(jnp.float32)                    # (bc, H, Wp)

        # pass 1: reflect + blur along H (sublane axis), full lane width
        top = [xb[:, j:j + 1, :] for j in range(p, 0, -1)]          # rows p..1
        bot = [xb[:, H - 1 - j:H - j, :] for j in range(1, p + 1)]  # rows H-2..H-1-p
        xpad = jnp.concatenate(top + [xb] + bot, axis=1)            # (bc, H+2p, Wp)
        tmp = _accumulate(_sym_tap_terms(lambda t: xpad[:, t:t + H, :], k, taps))

        # pass 2: reflect + blur along W (lane axis)
        out = _w_pass(tmp, k, taps, W, Wp, p)
        o_ref[...] = out.astype(o_ref.dtype)

    return kernel


def _make_tiled_kernel(k, taps, TH, W, Wp):
    """H-tiled path: the p-row halo was materialized in the wrapper."""
    p = k // 2

    def kernel(x_ref, o_ref):
        xb = x_ref[...].astype(jnp.float32)                    # (1, TH+2p, Wp)

        # pass 1: blur along H (halo rows already present)
        tmp = _accumulate(_sym_tap_terms(lambda t: xb[:, t:t + TH, :], k, taps))

        # pass 2: reflect + blur along W
        out = _w_pass(tmp, k, taps, W, Wp, p)
        o_ref[...] = out.astype(o_ref.dtype)

    return kernel


def _vmem_capacity_bytes():
    try:
        info = pltpu.get_tpu_info()
        cap = getattr(info, "vmem_capacity_bytes", None)
        if cap:
            return int(cap)
    except Exception:
        pass
    return 64 * 1024 * 1024  # conservative (v7x per-TC)


# ----------------------------------------------------------------------------
# Wrapper: fused reflection pad + separable depthwise Gaussian blur.
# ----------------------------------------------------------------------------
def gaussian_blur(x, kernel_size, *, force_h_tiling=False, tile_h=None):
    """x: (N, C, H, W); returns blurred (N, C, H, W) (same Gaussian per channel)."""
    N, C, H, W = x.shape
    k = int(kernel_size)
    assert k % 2 == 1
    p = k // 2
    assert p < H and p < W, "reflection padding requires kernel_size // 2 < H and < W"

    taps = [float(t) for t in gaussian_taps_1d(k)]  # compile-time constants
    NC = N * C

    # ---- lane-density: pad W up to a multiple of 128 (no-op for W % 128 == 0) ----
    Wp = _round_up(W, 128)
    x3 = x.reshape(NC, H, W)
    if Wp != W:
        x3 = jnp.pad(x3, ((0, 0), (0, 0), (0, Wp - W)))  # zero pad outside the kernel

    # ---- generation-aware VMEM budgets ----
    vmem_cap = _vmem_capacity_bytes()                 # 128 MiB v5e/v6e, 64 MiB v7x
    vmem_limit = min(vmem_cap * 3 // 4, 112 * 1024 * 1024)
    budget = vmem_cap // 2

    # True per-image footprint ~ (2k + 8) f32 slabs: 2x double-buffered in/out,
    # upcast, padded slabs, shifted-slice copies and partial accumulators.
    slabs = 2 * k + 8
    bytes_per_img = H * Wp * 4
    bc_budget = budget // (slabs * bytes_per_img)

    if not force_h_tiling and bc_budget >= 1:
        # -------------------- fused path: whole image per grid step --------------------
        bc = min(bc_budget, NC)
        if NC >= 4:
            bc = min(bc, NC // 4)    # >= 4 grid steps: both v7x TCs get double-buffering
        elif NC >= 2:
            bc = min(bc, NC // 2)
        bc = max(1, bc)
        while NC % bc:
            bc -= 1
        grid = (NC // bc,)

        out3 = pl.pallas_call(
            _make_fused_kernel(k, taps, H, W, Wp),
            out_shape=jax.ShapeDtypeStruct((NC, H, Wp), x.dtype),
            grid=grid,
            in_specs=[pl.BlockSpec((bc, H, Wp), lambda i: (i, 0, 0))],
            out_specs=pl.BlockSpec((bc, H, Wp), lambda i: (i, 0, 0)),
            compiler_params=pltpu.CompilerParams(
                dimension_semantics=("parallel",),
                vmem_limit_bytes=vmem_limit,
            ),
        )(x3)
        if Wp != W:
            out3 = out3[:, :, :W]
        return out3.reshape(N, C, H, W)

    # -------------------- H-tiled fallback: halo rows built in the wrapper ----------
    rows_budget = budget // (slabs * Wp * 4)
    if tile_h is not None:
        TH = max(8, (int(tile_h) // 8) * 8)
    else:
        TH = max(8, ((rows_budget - 2 * p) // 8) * 8)
    TH = min(TH, _round_up(H, 8))
    num_t = (H + TH - 1) // TH
    Hp_out = num_t * TH

    # reflect-pad by p (matches ReflectionPad2d), then zero-pad the tail so every
    # tile slice has exactly TH + 2p rows; garbage output rows are sliced off below.
    xpadH = jnp.pad(x3, ((0, 0), (p, p), (0, 0)), mode="reflect")   # (NC, H+2p, Wp)
    tail = Hp_out - H
    if tail:
        xpadH = jnp.pad(xpadH, ((0, 0), (0, tail), (0, 0)))
    tiles = jnp.stack(
        [xpadH[:, t * TH: t * TH + TH + 2 * p, :] for t in range(num_t)], axis=1
    ).reshape(NC * num_t, TH + 2 * p, Wp)

    out3 = pl.pallas_call(
        _make_tiled_kernel(k, taps, TH, W, Wp),
        out_shape=jax.ShapeDtypeStruct((NC * num_t, TH, Wp), x.dtype),
        grid=(NC * num_t,),
        in_specs=[pl.BlockSpec((1, TH + 2 * p, Wp), lambda i: (i, 0, 0))],
        out_specs=pl.BlockSpec((1, TH, Wp), lambda i: (i, 0, 0)),
        compiler_params=pltpu.CompilerParams(
            dimension_semantics=("parallel",),
            vmem_limit_bytes=vmem_limit,
        ),
    )(tiles)
    out3 = out3.reshape(NC, Hp_out, Wp)[:, :H, :W]
    return out3.reshape(N, C, H, W)


# ----------------------------------------------------------------------------
# Self test.
# ----------------------------------------------------------------------------
if __name__ == "__main__":
    kernel_size = 5

    # tap self-consistency: separable 1-D taps reproduce the full 2-D construction
    v = gaussian_taps_1d(kernel_size)
    w2d = np.outer(v, v).astype(np.float32)
    assert np.allclose(w2d, gaussian_blur_weight(kernel_size), atol=1e-6)

    def reference(x, k):
        n, c, h, w = x.shape
        pp = k // 2
        vv = gaussian_taps_1d(k)
        w2 = np.outer(vv, vv).astype(np.float32)
        xp = jnp.pad(x, ((0, 0), (0, 0), (pp, pp), (pp, pp)), mode="reflect")
        weight = jnp.asarray(np.broadcast_to(w2, (c, 1, k, k)).copy())
        return jax.lax.conv_general_dilated(
            xp, weight, window_strides=(1, 1), padding="VALID",
            dimension_numbers=("NCHW", "OIHW", "NCHW"), feature_group_count=c)

    key = jax.random.PRNGKey(0)
    k1, k2 = jax.random.split(key)

    # 1) fused path at the module's demo shape
    x = jax.random.normal(k1, (2, 4, 16, 16), dtype=jnp.float32)
    out = jax.block_until_ready(gaussian_blur(x, kernel_size))
    ref = reference(x, kernel_size)
    assert out.shape == x.shape
    assert jnp.allclose(out, ref, atol=1e-4, rtol=1e-4), "fused path mismatch"

    # 2) H-tiled fallback path (forced), with a ragged H so halo + tail logic is exercised
    x2 = jax.random.normal(k2, (1, 3, 20, 24), dtype=jnp.float32)
    out2 = jax.block_until_ready(
        gaussian_blur(x2, kernel_size, force_h_tiling=True, tile_h=8))
    ref2 = reference(x2, kernel_size)
    assert out2.shape == x2.shape
    assert jnp.allclose(out2, ref2, atol=1e-4, rtol=1e-4), "tiled path mismatch"

    print("KERNEL_OK")
</pallas_src>

<mosaic_0001>
module attributes {stable_mosaic.version = 11 : i64} {
  func.func @kernel(%arg0: i32, %arg1: memref<2x16x128xf32, #tpu.memory_space<vmem>>, %arg2: memref<2x16x128xf32, #tpu.memory_space<vmem>>) attributes {dimension_semantics = [#tpu.dimension_semantics<parallel>], iteration_bounds = array<i64: 4>, scalar_prefetch = 0 : i64, scratch_operands = 0 : i64, tpu.core_type = #tpu.core_type<tc>, window_params = [{transform_indices = @transform_0, window_bounds = array<i64: 2, 16, 128>}, {transform_indices = @transform_1, window_bounds = array<i64: 2, 16, 128>}]} {
    %c0 = arith.constant 0 : index
    %c0_0 = arith.constant 0 : index
    %c0_1 = arith.constant 0 : index
    %0 = vector.load %arg1[%c0, %c0_0, %c0_1] : memref<2x16x128xf32, #tpu.memory_space<vmem>>, vector<2x16x128xf32>
    %1 = vector.extract_strided_slice %0 {offsets = [0, 2, 0], sizes = [2, 1, 128], strides = [1, 1, 1]} : vector<2x16x128xf32> to vector<2x1x128xf32>
    %2 = vector.extract_strided_slice %0 {offsets = [0, 1, 0], sizes = [2, 1, 128], strides = [1, 1, 1]} : vector<2x16x128xf32> to vector<2x1x128xf32>
    %3 = vector.extract_strided_slice %0 {offsets = [0, 14, 0], sizes = [2, 1, 128], strides = [1, 1, 1]} : vector<2x16x128xf32> to vector<2x1x128xf32>
    %4 = vector.extract_strided_slice %0 {offsets = [0, 13, 0], sizes = [2, 1, 128], strides = [1, 1, 1]} : vector<2x16x128xf32> to vector<2x1x128xf32>
    %5 = tpu.concatenate %1, %2, %0, %3, %4 in 1 : vector<2x1x128xf32>, vector<2x1x128xf32>, vector<2x16x128xf32>, vector<2x1x128xf32>, vector<2x1x128xf32> -> vector<2x20x128xf32>
    %6 = vector.extract_strided_slice %5 {offsets = [0, 0, 0], sizes = [2, 16, 128], strides = [1, 1, 1]} : vector<2x20x128xf32> to vector<2x16x128xf32>
    %7 = vector.extract_strided_slice %5 {offsets = [0, 4, 0], sizes = [2, 16, 128], strides = [1, 1, 1]} : vector<2x20x128xf32> to vector<2x16x128xf32>
    %8 = arith.addf %6, %7 : vector<2x16x128xf32>
    %cst = arith.constant 0.0782501251 : f32
    %9 = vector.broadcast %cst : f32 to vector<2x16x128xf32>
    %10 = arith.mulf %9, %8 : vector<2x16x128xf32>
    %11 = vector.extract_strided_slice %5 {offsets = [0, 1, 0], sizes = [2, 16, 128], strides = [1, 1, 1]} : vector<2x20x128xf32> to vector<2x16x128xf32>
    %12 = vector.extract_strided_slice %5 {offsets = [0, 3, 0], sizes = [2, 16, 128], strides = [1, 1, 1]} : vector<2x20x128xf32> to vector<2x16x128xf32>
    %13 = arith.addf %11, %12 : vector<2x16x128xf32>
    %cst_2 = arith.constant 0.240408137 : f32
    %14 = vector.broadcast %cst_2 : f32 to vector<2x16x128xf32>
    %15 = arith.mulf %14, %13 : vector<2x16x128xf32>
    %16 = vector.extract_strided_slice %5 {offsets = [0, 2, 0], sizes = [2, 16, 128], strides = [1, 1, 1]} : vector<2x20x128xf32> to vector<2x16x128xf32>
    %cst_3 = arith.constant 0.362683475 : f32
    %17 = vector.broadcast %cst_3 : f32 to vector<2x16x128xf32>
    %18 = arith.mulf %17, %16 : vector<2x16x128xf32>
    %19 = arith.addf %10, %15 : vector<2x16x128xf32>
    %20 = arith.addf %19, %18 : vector<2x16x128xf32>
    %21 = vector.extract_strided_slice %20 {offsets = [0, 0, 0], sizes = [2, 16, 16], strides = [1, 1, 1]} : vector<2x16x128xf32> to vector<2x16x16xf32>
    %22 = vector.extract_strided_slice %21 {offsets = [0, 0, 2], sizes = [2, 16, 1], strides = [1, 1, 1]} : vector<2x16x16xf32> to vector<2x16x1xf32>
    %23 = vector.extract_strided_slice %21 {offsets = [0, 0, 1], sizes = [2, 16, 1], strides = [1, 1, 1]} : vector<2x16x16xf32> to vector<2x16x1xf32>
    %24 = vector.extract_strided_slice %21 {offsets = [0, 0, 14], sizes = [2, 16, 1], strides = [1, 1, 1]} : vector<2x16x16xf32> to vector<2x16x1xf32>
    %25 = vector.extract_strided_slice %21 {offsets = [0, 0, 13], sizes = [2, 16, 1], strides = [1, 1, 1]} : vector<2x16x16xf32> to vector<2x16x1xf32>
    %26 = tpu.concatenate %22, %23, %21, %24, %25 in 2 : vector<2x16x1xf32>, vector<2x16x1xf32>, vector<2x16x16xf32>, vector<2x16x1xf32>, vector<2x16x1xf32> -> vector<2x16x20xf32>
    %27 = vector.extract_strided_slice %26 {offsets = [0, 0, 0], sizes = [2, 16, 16], strides = [1, 1, 1]} : vector<2x16x20xf32> to vector<2x16x16xf32>
    %28 = vector.extract_strided_slice %26 {offsets = [0, 0, 4], sizes = [2, 16, 16], strides = [1, 1, 1]} : vector<2x16x20xf32> to vector<2x16x16xf32>
    %29 = arith.addf %27, %28 : vector<2x16x16xf32>
    %cst_4 = arith.constant 0.0782501251 : f32
    %30 = vector.broadcast %cst_4 : f32 to vector<2x16x16xf32>
    %31 = arith.mulf %30, %29 : vector<2x16x16xf32>
    %32 = vector.extract_strided_slice %26 {offsets = [0, 0, 1], sizes = [2, 16, 16], strides = [1, 1, 1]} : vector<2x16x20xf32> to vector<2x16x16xf32>
    %33 = vector.extract_strided_slice %26 {offsets = [0, 0, 3], sizes = [2, 16, 16], strides = [1, 1, 1]} : vector<2x16x20xf32> to vector<2x16x16xf32>
    %34 = arith.addf %32, %33 : vector<2x16x16xf32>
    %cst_5 = arith.constant 0.240408137 : f32
    %35 = vector.broadcast %cst_5 : f32 to vector<2x16x16xf32>
    %36 = arith.mulf %35, %34 : vector<2x16x16xf32>
    %37 = vector.extract_strided_slice %26 {offsets = [0, 0, 2], sizes = [2, 16, 16], strides = [1, 1, 1]} : vector<2x16x20xf32> to vector<2x16x16xf32>
    %cst_6 = arith.constant 0.362683475 : f32
    %38 = vector.broadcast %cst_6 : f32 to vector<2x16x16xf32>
    %39 = arith.mulf %38, %37 : vector<2x16x16xf32>
    %40 = arith.addf %31, %36 : vector<2x16x16xf32>
    %41 = arith.addf %40, %39 : vector<2x16x16xf32>
    %cst_7 = arith.constant 0.000000e+00 : f32
    %42 = vector.broadcast %cst_7 : f32 to vector<2x16x112xf32>
    %43 = tpu.concatenate %41, %42 in 2 : vector<2x16x16xf32>, vector<2x16x112xf32> -> vector<2x16x128xf32>
    %c0_8 = arith.constant 0 : index
    %c0_9 = arith.constant 0 : index
    %c0_10 = arith.constant 0 : index
    %44 = vector.load %arg2[%c0_8, %c0_9, %c0_10] : memref<2x16x128xf32, #tpu.memory_space<vmem>>, vector<2x16x128xf32>
    tpu.vector_store %arg2[%c0_8, %c0_9, %c0_10], %43 {strides = array<i32>} : memref<2x16x128xf32, #tpu.memory_space<vmem>>, vector<2x16x128xf32>,
    return
  }
  func.func @transform_0(%arg0: i32) -> (i32, i32, i32) {
    %c0_i32 = arith.constant 0 : i32
    %c0_i32_0 = arith.constant 0 : i32
    %c0_i32_1 = arith.constant 0 : i32
    return %arg0, %c0_i32, %c0_i32_0 : i32, i32, i32
  }
  func.func @transform_1(%arg0: i32) -> (i32, i32, i32) {
    %c0_i32 = arith.constant 0 : i32
    %c0_i32_0 = arith.constant 0 : i32
    %c0_i32_1 = arith.constant 0 : i32
    return %arg0, %c0_i32, %c0_i32_0 : i32, i32, i32
  }
}

</mosaic_0001>

<bundles_post_ra>
// kernel: tpu_custom_call.1
= control target key start
LH: loop header
LB: loop body
LE: loop exit
PB: predicated region body
PF: predicated region fallthrough
CT: control target
= control target key end

     0   :  { %6 = vsyncpa [#allocation3], 0  ;;  %s977_s0 = inlined_call_operand.hbm [shape: f32[8,16,128], index: 0, kind: input, shape index: {}]   ;;  %s978_s1 = inlined_call_operand.hbm [shape: f32[8,16,128], index: 1, kind: output, shape index: {}]  }
   0x1   :  { %8 = vsyncpa [#allocation3 + $0x1], 0 }
   0x2   :  { %9 = vsyncpa [#allocation4], 0 }
   0x3   :  { %11 = vsyncpa [#allocation4 + $0x1], 0  ;;  %s745_s6 = smov 0   ;;  %s747_s7 = smov 0  }
   0x4   :  { %s749_s8 = smov 0   ;;  %s751_s9 = smov 0  }
   0x5 LB: > { %s766_s10 = sadd.s32 4294967295, %s721_s9   ;;  %s549_s11 = sadd.s32 4294967294, %s721_s9   ;;  %s721_s9 = sphi %s751_s9, %s990_s9   ;;  %s717_s8 = sphi %s749_s8, %s989_s8   ;;  %s713_s7 = sphi %s747_s7, %s988_s7   ;;  %s709_s6 = sphi %s745_s6, %s987_s6  }
   0x6   : > { %s770_s12 = sadd.s32 1, %s721_s9   ;;  %s24_s13 = sadd.s32 1, %s717_s8 }
   0x7   : > { %s21_s14 = ssub.s32 %s721_s9, %s770_s12  ;;  %p31_p0 = scmp.ne.s32.totalorder %s717_s8, %s713_s7 }
   0x8   : > { %p22_p1 = scmp.eq.s32.totalorder %s21_s14, 0  ;;  %p32_p2 = scmp.eq.s32.totalorder %s721_s9, 0 }
   0x9   : > { %p37_p3 = scmp.ne.s32.totalorder %s713_s7, %s709_s6  ;;  %p38_p4 = scmp.eq.s32.totalorder %s766_s10, 0 }
   0xa   : > { %s782_s15 = scalar_select %p22_p1, %s717_s8, %s24_s13  }
   0xb   : > { %p784_p5 = por %p32_p2, %p31_p0  ;;  %p788_p6 = por %p38_p4, %p37_p3 }
   0xc   : > { %p61_p7 = scmp.eq.s32.totalorder %s766_s10, 3  ;;  %p67_p8 = scmp.eq.s32.totalorder %s549_s11, 3 }
   0xd   : > { %p581_p9 = scmp.lt.s32.totalorder %s721_s9, 4  ;;  %s87_s20 = sand.u32 1, %s717_s8  }
   0xe   : > { %p794_p10 = por %p61_p7, %p31_p0  ;;  %p798_p11 = por %p67_p8, %p37_p3 }
   0xf   : > { %s566_s21 = sshll.u32 %s721_s9, 9  ;;  %s552_s22 = sshll.u32 %s87_s20, 5 }
  0x10   : > { %s982_s18 = scalar_select %p794_p10, 1, 0 }
  0x11   : > { %s983_s19 = scalar_select %p798_p11, 1, 0 }
  0x12   : > { %s807_s25 = scalar_lea.hbm %s977_s0, %s566_s21  ;;  %s91_s26 = scalar_lea.vmem [#allocation2], %s552_s22 }
  0x13   : > { %s99_s27 = sshll.u32 %s91_s26, 4  ;;  %p811_p12 = pnand %p581_p9, %p784_p5  ;;  %s815_s27 = int_to_ptr.vmem [resolvable:$true] %s99_s27 }
  0x14   : > { %s817_s29 = scalar_lea.sflag [#allocation3], %s87_s20  ;;  %s625_s30 = scalar_lea.hbm %s807_s25, 512 }
  0x15   : > { %p626_p13 = scmp.ne.s32.totalorder %s807_s25, %s625_s30  ;;  %p627_p0 = pneg %p811_p12 }
  0x16   : > { %s630_s4 = scalar_lea.hbm %s977_s0, 2048  ;;  %p631_p3 = scmp.lt.u32.totalorder %s807_s25, %s977_s0 }
  0x17   : > { %p628_p1 = pnand %p627_p0, %p626_p13  ;;  %p632_p4 = scmp.lt.u32.totalorder %s630_s4, %s625_s30 }
  0x18   : > { %p634_p7 = scmp.lt.u32.totalorder %s625_s30, %s807_s25 }
  0x19   : > { %p629_p2 = pneg %p628_p1  ;;  %p633_p5 = por %p632_p4, %p631_p3 }
  0x1b   : > { %p635_p8 = por %p634_p7, %p633_p5 }
  0x1d   : > { %p636_p9 = pnand %p635_p8, %p629_p2 }
  0x1f   : > { %639 = shalt.err (!%p636_p9)
}
  0x20   : > { %s640_s13 = scalar_lea.vmem %s815_s27, 512  ;;  %s723_s14 = smov [#allocation2]  }
  0x21   : > { %p641_p13 = scmp.ne.s32.totalorder %s815_s27, %s640_s13  ;;  %s645_s16 = sshll.u32 %s723_s14, 4  ;;  %s646_s16 = int_to_ptr.vmem [resolvable:$false] %s645_s16 }
  0x22   : > { %s647_s20 = scalar_lea.vmem %s646_s16, 1024  ;;  %p648_p10 = scmp.lt.s32.totalorder %s815_s27, %s646_s16 }
  0x23   : > { %p643_p1 = pnand %p641_p13, %p627_p0  ;;  %p649_p3 = scmp.lt.s32.totalorder %s647_s20, %s640_s13 }
  0x25   : > { %p644_p11 = pneg %p643_p1  ;;  %p650_p4 = por %p649_p3, %p648_p10 }
  0x27   : > { %p651_p5 = pnand %p650_p4, %p644_p11 }
  0x29   : > { %654 = shalt.err (!%p651_p5)
}
  0x2a   : > { %s724_s21 = smov 128   ;;  %s725_s22 = smov 8  }
  0x2b   : > { %576 = dma.hbm_to_vmem [thread:$0]  (!%p811_p12), %s807_s25, 512, %s815_s27, %s817_s29, %s724_s21, %s724_s21, %s725_s22  }
  0x2c   : > { %p556_p0 = scmp.ge.s32.totalorder %s721_s9, 1  ;;  %p107_p2 = scmp.lt.s32.totalorder %s721_s9, 5 }
  0x2e   : > { %p108_p7 = pnand %p556_p0, %p107_p2 }
  0x2f   : > { %s848_s23 = sand.u32 (!%p108_p7), 1, %s713_s7  }
  0x30   : > { %111 = sbr.rel (%p108_p7) target bundleno = 482 (0x1e2), region = 24  ;;  %s557_s24 = sshll.u32 (!%p108_p7), %s848_s23, 5 }
  0x31   : > { %s114_s26 = scalar_lea.sflag (!%p108_p7), [#allocation3], %s848_s23  ;;  %s117_s30 = scalar_lea.vmem (!%p108_p7), [#allocation2], %s557_s24 }
  0x37   : > { %700 = dma.done.wait (%p788_p6), %s114_s26, 512  }
  0x38   : > { %702 = vsyncadd (%p788_p6), %s114_s26, 4294966784  ;;  %vm150_vm0 = vcmask 1041408   ;;  %vm171_vm1 = vcmask 1040384   ;;  %v140_v0 = vld [vmem:[%s117_s30 + $0x10] sm:$0xff]  ;;  %v141_v1 = vld [vmem:[%s117_s30 + $0x18] sm:$0xff]  ;;  %vm178_vm2 = vcmask 1042432  }
  0x39   : > { %vm185_vm3 = vcmask 1043456   ;;  %vm208_vm4 = vcmask 1045504   ;;  %v138_v2 = vld [vmem:[%s117_s30] sm:$0xff]  ;;  %v145_v3 = vrot.slane %v140_v0, 2  ;;  %v154_v4 = vrot.slane %v140_v0, 6  ;;  %v139_v7 = vld [vmem:[%s117_s30 + $0x8] sm:$0xff] }
  0x3a   : > { %v155_v5 = vrot.slane %v141_v1, 6  ;;  %v164_v6 = vrot.slane %v141_v1, 4  ;;  %v168_v8 = vrot.slane %v141_v1, 2  ;;  %v144_v9 = vrot.slane %v138_v2, 2  ;;  %s726_s17 = smov 126   ;;  %s727_s25 = smov 2  }
  0x3b   : > { %v151_v10 = vrot.slane %v138_v2, 6  ;;  %v152_v11 = vrot.slane %v139_v7, 6  ;;  %v173_v13 = vsel %vm171_vm1, %v145_v3, %v140_v0  ;;  %vm249_vm5 = vcmask 1046528   ;;  %s728_s27 = smov 4   ;;  %s729_s28 = smov 6  }
  0x3c   : > { %v156_v12 = vsel %vm150_vm0, %v154_v4, %v155_v5  ;;  %v177_v14 = vsel %vm150_vm0, %v155_v5, %v164_v6  ;;  %v163_v15 = vrot.slane %v139_v7, 4  ;;  %v175_v16 = vsel %vm150_vm0, %v173_v13, %v154_v4  ;;  %s730_s29 = smov 124   ;;  %s731_s2 = smov 127  }
  0x3d   : > { %v180_v17 = vsel %vm178_vm2, %v177_v14, %v168_v8  ;;  %v192_v18 = vrot.slane %v156_v12, 4  ;;  %v215_v19 = vrot.slane %v156_v12, 2  ;;  %v191_v20 = vrot.slane %v175_v16, 4  ;;  %s135_s3 = scalar_lea.vmem [#allocation5], %s557_s24  ;;  %s568_s5 = sshll.u32 %s766_s10, 9 }
  0x3e   : > { %v214_v21 = vrot.slane %v175_v16, 2  ;;  %v217_v22 = vrot.slane %v180_v17, 2  ;;  %v240_v23 = vmul.f32 0.36268348, %v175_v16  ;;  %v863_v24 = vmul.f32 0.36268348, %v156_v12  ;;  %s933_s14 = scalar_lea.hbm %s978_s1, %s568_s5 }
  0x3f   : > { %v153_v25 = vsel %vm150_vm0, %v151_v10, %v152_v11  ;;  %v167_v26 = vrot.slane %v139_v7, 2  ;;  %v172_v27 = vsel %vm171_vm1, %v144_v9, %v138_v2  ;;  %v193_v28 = vsel %vm185_vm3, %v191_v20, %v192_v18  ;;  %s476_s4 = sshll.u32 %s135_s3, 4  ;;  %s462_s10 = scalar_lea.sflag [#allocation4], %s848_s23  ;;  %s927_s4 = int_to_ptr.vmem [resolvable:$true] %s476_s4 }
  0x40   : > { %v216_v29 = vsel %vm208_vm4, %v214_v21, %v215_v19  ;;  %v218_v30 = vsel %vm208_vm4, %v215_v19, %v217_v22  ;;  %v279_v31 = vrot.slane %v240_v23, 2  ;;  %v202_v32 = vadd.f32 %v193_v28, %v175_v16  ;;  %s655_s16 = scalar_lea.vmem %s927_s4, 512  ;;  %p985_p10 = scmp.ne.s32.totalorder %s982_s18, 0 }
  0x41   : > { %v228_v33 = vadd.f32 %v216_v29, %v175_v16  ;;  %v229_v34 = vadd.f32 %v218_v30, %v156_v12  ;;  %v280_v35 = vrot.slane %v863_v24, 2  ;;  %v174_v36 = vsel %vm150_vm0, %v172_v27, %v151_v10  ;;  %p656_p6 = scmp.ne.s32.totalorder %s927_s4, %s655_s16  ;;  %s732_s20 = smov [#allocation5]  }
  0x42   : > { %v176_v37 = vsel %vm150_vm0, %v152_v11, %v163_v15  ;;  %v187_v38 = vrot.slane %v153_v25, 4  ;;  %v210_v39 = vrot.slane %v153_v25, 2  ;;  %v206_v40 = vmul.f32 0.078250125, %v202_v32  ;;  %s659_s21 = sshll.u32 %s732_s20, 4  ;;  %s660_s21 = int_to_ptr.vmem [resolvable:$false] %s659_s21 }
  0x43   : > { %v234_v41 = vmul.f32 0.24040814, %v228_v33  ;;  %v235_v42 = vmul.f32 0.24040814, %v229_v34  ;;  %v179_v43 = vsel %vm178_vm2, %v176_v37, %v167_v26  ;;  %v186_v44 = vrot.slane %v174_v36, 4  ;;  %p657_p11 = pnand %p656_p6, %p985_p10  ;;  %s661_s22 = scalar_lea.vmem %s660_s21, 1024 }
  0x44   : > { %v209_v45 = vrot.slane %v174_v36, 2  ;;  %v237_v46 = vmul.f32 0.36268348, %v174_v36  ;;  %v212_v49 = vrot.slane %v179_v43, 2  ;;  %v238_v50 = vmul.f32 0.36268348, %v153_v25  ;;  %p662_p8 = scmp.lt.s32.totalorder %s927_s4, %s660_s21  ;;  %p663_p9 = scmp.lt.s32.totalorder %s661_s22, %s655_s16 }
  0x45   : > { %v255_v47 = vrot.slane %v234_v41, 1  ;;  %v256_v48 = vrot.slane %v235_v42, 1  ;;  %v281_v51 = vsel %vm208_vm4, %v279_v31, %v280_v35  ;;  %v188_v52 = vsel %vm185_vm3, %v186_v44, %v187_v38  ;;  %p658_p12 = pneg %p657_p11 }
  0x46   : > { %v211_v53 = vsel %vm208_vm4, %v209_v45, %v210_v39  ;;  %v194_v54 = vrot.slane %v180_v17, 4  ;;  %v200_v56 = vadd.f32 %v188_v52, %v174_v36  ;;  %v213_v57 = vsel %vm208_vm4, %v210_v39, %v212_v49  ;;  %p664_p13 = por %p663_p9, %p662_p8 }
  0x47   : > { %v257_v55 = vsel %vm249_vm5, %v255_v47, %v256_v48  ;;  %v225_v58 = vadd.f32 %v211_v53, %v174_v36  ;;  %v226_v60 = vadd.f32 %v213_v57, %v153_v25  ;;  %v274_v61 = vrot.slane %v237_v46, 2 }
  0x48   : > { %v266_v59 = vadd.f32 %v257_v55, %v206_v40  ;;  %v195_v62 = vsel %vm185_vm3, %v192_v18, %v194_v54  ;;  %v275_v0 = vrot.slane %v238_v50, 2  ;;  %v230_v2 = vadd.f32 %v217_v22, %v180_v17  ;;  %p665_p1 = pnand %p664_p13, %p658_p12 }
  0x49   : > { %v231_v63 = vmul.f32 0.24040814, %v225_v58  ;;  %v203_v1 = vadd.f32 %v195_v62, %v156_v12  ;;  %v204_v4 = vmul.f32 0.078250125, %v200_v56  ;;  %v232_v5 = vmul.f32 0.24040814, %v226_v60 }
  0x4a   : > { %v880_v3 = vadd.f32 %v281_v51, %v266_v59  ;;  %v242_v6 = vmul.f32 0.36268348, %v180_v17  ;;  %v236_v9 = vmul.f32 0.24040814, %v230_v2  ;;  %v189_v10 = vrot.slane %v179_v43, 4 }
  0x4b   : > { %v250_v7 = vrot.slane %v231_v63, 1  ;;  %v207_v8 = vmul.f32 0.078250125, %v203_v1  ;;  %v251_v11 = vrot.slane %v232_v5, 1  ;;  %v227_v14 = vadd.f32 %v212_v49, %v179_v43 }
  0x4c   : > { %300 = vrot.lane.b32.xlu1 %v880_v3, %s726_s17  ;;  %v282_v13 = vrot.slane %v242_v6, 2  ;;  %v239_v15 = vmul.f32 0.36268348, %v179_v43  ;;  %v258_v16 = vrot.slane %v236_v9, 1  ;;  %v190_v12 = vsel %vm185_vm3, %v187_v38, %v189_v10 }
  0x4d   : > { %v252_v18 = vsel %vm249_vm5, %v250_v7, %v251_v11  ;;  %v276_v19 = vsel %vm208_vm4, %v274_v61, %v275_v0  ;;  %v201_v17 = vadd.f32 %v190_v12, %v153_v25  ;;  %v233_v20 = vmul.f32 0.24040814, %v227_v14 }
  0x4e   : > { %v264_v21 = vadd.f32 %v252_v18, %v204_v4  ;;  %v259_v22 = vsel %vm249_vm5, %v256_v48, %v258_v16  ;;  %v283_v23 = vsel %vm208_vm4, %v280_v35, %v282_v13  ;;  %v277_v24 = vrot.slane %v239_v15, 2 }
  0x4f   : > { %v267_v26 = vadd.f32 %v259_v22, %v207_v8  ;;  %v205_v27 = vmul.f32 0.078250125, %v201_v17  ;;  %v253_v28 = vrot.slane %v233_v20, 1  ;;  %vm349_vm6 = vcmask 15360  }
  0x50   : > { %v288_v29 = vadd.f32 %v276_v19, %v264_v21  ;;  %v278_v32 = vsel %vm208_vm4, %v275_v0, %v277_v24  ;;  %vm344_vm7 = vcmask 7168   ;;  %vm354_vm8 = vcmask 146432  }
  0x51   : > { %v291_v30 = vadd.f32 %v283_v23, %v267_v26  ;;  %v254_v31 = vsel %vm249_vm5, %v251_v11, %v253_v28  ;;  %vm359_vm9 = vcmask 154624   ;;  %vm452_vm10 = vcmask 130048  }
  0x52   : > { %296 = vrot.lane.b32.xlu0 %v288_v29, %s726_s17  ;;  %v265_v33 = vadd.f32 %v254_v31, %v205_v27 }
  0x53   : > { %302 = vrot.lane.b32.xlu1 %v291_v30, %s726_s17 }
  0x54   : > { %v289_v25 = vadd.f32 %v278_v32, %v265_v33 }
  0x56   : > { %298 = vrot.lane.b32.xlu0 %v289_v25, %s726_s17 }
  0x57   : > { %310 = vrot.lane.b32.xlu1 %v289_v25, %s727_s25 }
  0x5a   : > { %308 = vrot.lane.b32.xlu0 %v288_v29, %s727_s25 }
  0x5b   : > { %314 = vrot.lane.b32.xlu1 %v291_v30, %s727_s25 }
  0x5e   : > { %312 = vrot.lane.b32.xlu0 %v880_v3, %s727_s25 }
  0x5f   : > { %322 = vrot.lane.b32.xlu1 %v289_v25, %s728_s27 }
  0x62   : > { %320 = vrot.lane.b32.xlu0 %v288_v29, %s728_s27 }
  0x63   : > { %326 = vrot.lane.b32.xlu1 %v291_v30, %s728_s27 }
  0x66   : > { %324 = vrot.lane.b32.xlu0 %v880_v3, %s728_s27 }
  0x67   : > { %334 = vrot.lane.b32.xlu1 %v289_v25, %s729_s28 }
  0x6a   : > { %332 = vrot.lane.b32.xlu0 %v288_v29, %s729_s28 }
  0x6b   : > { %338 = vrot.lane.b32.xlu1 %v291_v30, %s729_s28 }
  0x6e   : > { %336 = vrot.lane.b32.xlu0 %v880_v3, %s729_s28 }
  0xbe   : > { %v301_v34 = vpop.permute.xlu1 %300 }
  0xbf   : > { %v347_v60 = vsel %vm344_vm7, %v301_v34, %v880_v3 }
  0xc4   : > { %v297_v35 = vpop.permute.xlu0 %296 }
  0xc5   : > { %v303_v36 = vpop.permute.xlu1 %302  ;;  %v345_v50 = vsel %vm344_vm7, %v297_v35, %v288_v29 }
  0xc6   : > { %v348_v52 = vsel %vm344_vm7, %v303_v36, %v291_v30 }
  0xc8   : > { %v299_v37 = vpop.permute.xlu0 %298 }
  0xc9   : > { %v311_v38 = vpop.permute.xlu1 %310  ;;  %v346_v45 = vsel %vm344_vm7, %v299_v37, %v289_v25 }
  0xca   : > { %v351_v46 = vsel %vm349_vm6, %v346_v45, %v311_v38 }
  0xcc   : > { %v309_v39 = vpop.permute.xlu0 %308 }
  0xcd   : > { %v315_v40 = vpop.permute.xlu1 %314  ;;  %v350_v53 = vsel %vm349_vm6, %v345_v50, %v309_v39 }
  0xce   : > { %v353_v54 = vsel %vm349_vm6, %v348_v52, %v315_v40 }
  0xd0   : > { %v313_v41 = vpop.permute.xlu0 %312 }
  0xd1   : > { %v323_v42 = vpop.permute.xlu1 %322  ;;  %v352_v62 = vsel %vm349_vm6, %v347_v60, %v313_v41 }
  0xd2   : > { %v356_v48 = vsel %vm354_vm8, %v351_v46, %v323_v42 }
  0xd4   : > { %v321_v43 = vpop.permute.xlu0 %320 }
  0xd5   : > { %v327_v44 = vpop.permute.xlu1 %326  ;;  %v355_v55 = vsel %vm354_vm8, %v350_v53, %v321_v43 }
  0xd6   : > { %v358_v57 = vsel %vm354_vm8, %v353_v54, %v327_v44 }
  0xd8   : > { %v325_v47 = vpop.permute.xlu0 %324 }
  0xd9   : > { %v335_v49 = vpop.permute.xlu1 %334  ;;  %v357_v63 = vsel %vm354_vm8, %v352_v62, %v325_v47 }
  0xda   : > { %v361_v51 = vsel %vm359_vm9, %v356_v48, %v335_v49 }
  0xdb   : > { %390 = vrot.lane.b32.xlu1 %v361_v51, %s726_s17  ;;  %v409_v2 = vmul.f32 0.36268348, %v361_v51 }
  0xdc   : > { %v333_v56 = vpop.permute.xlu0 %332 }
  0xdd   : > { %v360_v58 = vsel %vm359_vm9, %v355_v55, %v333_v56  ;;  %v339_v59 = vpop.permute.xlu1 %338 }
  0xde   : > { %388 = vrot.lane.b32.xlu0 %v360_v58, %s726_s17  ;;  %v363_v61 = vsel %vm359_vm9, %v358_v57, %v339_v59  ;;  %v408_v3 = vmul.f32 0.36268348, %v360_v58 }
  0xdf   : > { %394 = vrot.lane.b32.xlu1 %v363_v61, %s726_s17  ;;  %v411_v12 = vmul.f32 0.36268348, %v363_v61 }
  0xe0   : > { %v337_v0 = vpop.permute.xlu0 %336 }
  0xe1   : > { %v362_v1 = vsel %vm359_vm9, %v357_v63, %v337_v0 }
  0xe2   : > { %392 = vrot.lane.b32.xlu0 %v362_v1, %s726_s17  ;;  %v410_v18 = vmul.f32 0.36268348, %v362_v1 }
  0xe3   : > { %370 = vrot.lane.b32.xlu1 %v361_v51, %s730_s29 }
  0xe6   : > { %368 = vrot.lane.b32.xlu0 %v360_v58, %s730_s29 }
  0xe7   : > { %374 = vrot.lane.b32.xlu1 %v363_v61, %s730_s29 }
  0xea   : > { %372 = vrot.lane.b32.xlu0 %v362_v1, %s730_s29 }
  0xeb   : > { %438 = vrot.lane.b32.xlu1 %v409_v2, %s726_s17 }
  0xee   : > { %436 = vrot.lane.b32.xlu0 %v408_v3, %s726_s17 }
 0x14d   : > { %v391_v4 = vpop.permute.xlu1 %390 }
 0x14e   : > { %v401_v5 = vadd.f32 %v391_v4, %v361_v51 }
 0x150   : > { %v405_v6 = vmul.f32 0.24040814, %v401_v5  ;;  %v389_v7 = vpop.permute.xlu0 %388 }
 0x151   : > { %v400_v8 = vadd.f32 %v389_v7, %v360_v58  ;;  %v395_v9 = vpop.permute.xlu1 %394 }
 0x152   : > { %v403_v10 = vadd.f32 %v395_v9, %v363_v61  ;;  %418 = vrot.lane.b32.xlu1 %v405_v6, %s731_s2 }
 0x153   : > { %v404_v11 = vmul.f32 0.24040814, %v400_v8 }
 0x154   : > { %v407_v13 = vmul.f32 0.24040814, %v403_v10  ;;  %v393_v14 = vpop.permute.xlu0 %392 }
 0x155   : > { %v402_v15 = vadd.f32 %v393_v14, %v362_v1  ;;  %416 = vrot.lane.b32.xlu0 %v404_v11, %s731_s2  ;;  %v371_v19 = vpop.permute.xlu1 %370 }
 0x156   : > { %422 = vrot.lane.b32.xlu1 %v407_v13, %s731_s2  ;;  %v381_v22 = vadd.f32 %v371_v19, %v361_v51 }
 0x157   : > { %v406_v16 = vmul.f32 0.24040814, %v402_v15 }
 0x158   : > { %v369_v17 = vpop.permute.xlu0 %368  ;;  %v385_v26 = vmul.f32 0.078250125, %v381_v22 }
 0x159   : > { %420 = vrot.lane.b32.xlu0 %v406_v16, %s731_s2  ;;  %v375_v20 = vpop.permute.xlu1 %374  ;;  %v380_v24 = vadd.f32 %v369_v17, %v360_v58 }
 0x15a   : > { %442 = vrot.lane.b32.xlu1 %v411_v12, %s726_s17  ;;  %v383_v29 = vadd.f32 %v375_v20, %v363_v61 }
 0x15b   : > { %v384_v31 = vmul.f32 0.078250125, %v380_v24 }
 0x15c   : > { %v373_v21 = vpop.permute.xlu0 %372  ;;  %v387_v36 = vmul.f32 0.078250125, %v383_v29 }
 0x15d   : > { %440 = vrot.lane.b32.xlu0 %v410_v18, %s726_s17  ;;  %v439_v23 = vpop.permute.xlu1 %438  ;;  %v382_v25 = vadd.f32 %v373_v21, %v362_v1 }
 0x15f   : > { %v386_v41 = vmul.f32 0.078250125, %v382_v25 }
 0x160   : > { %v437_v27 = vpop.permute.xlu0 %436 }
 0x1c4   : > { %v419_v28 = vpop.permute.xlu1 %418 }
 0x1c5   : > { %v429_v30 = vadd.f32 %v419_v28, %v385_v26 }
 0x1c7   : > { %v449_v32 = vadd.f32 %v439_v23, %v429_v30  ;;  %v417_v33 = vpop.permute.xlu0 %416 }
 0x1c8   : > { %v428_v34 = vadd.f32 %v417_v33, %v384_v31  ;;  %v423_v35 = vpop.permute.xlu1 %422 }
 0x1c9   : > { %v454_v37 = vsel %vm452_vm10, %v449_v32, 0.0  ;;  %v431_v39 = vadd.f32 %v423_v35, %v387_v36 }
 0x1ca   : > { %458 = vst [vmem:[%s135_s3 + $0x8] sm:$0xff] %v454_v37  ;;  %v448_v38 = vadd.f32 %v437_v27, %v428_v34 }
 0x1cb   : > { %v421_v40 = vpop.permute.xlu0 %420 }
 0x1cc   : > { %v453_v42 = vsel %vm452_vm10, %v448_v38, 0.0  ;;  %v443_v43 = vpop.permute.xlu1 %442  ;;  %v430_v45 = vadd.f32 %v421_v40, %v386_v41 }
 0x1cd   : > { %457 = vst [vmem:[%s135_s3] sm:$0xff] %v453_v42  ;;  %v451_v44 = vadd.f32 %v443_v43, %v431_v39 }
 0x1cf   : > { %v456_v46 = vsel %vm452_vm10, %v451_v44, 0.0  ;;  %v441_v47 = vpop.permute.xlu0 %440 }
 0x1d0   : > { %460 = vst [vmem:[%s135_s3 + $0x18] sm:$0xff] %v456_v46  ;;  %v450_v48 = vadd.f32 %v441_v47, %v430_v45 }
 0x1d2   : > { %v455_v49 = vsel %vm452_vm10, %v450_v48, 0.0 }
 0x1d3   : > { %459 = vst [vmem:[%s135_s3 + $0x10] sm:$0xff] %v455_v49 }
 0x1d4   : > { %668 = shalt.err (!%p665_p1)
}
 0x1d5   : > { %s669_s24 = scalar_lea.hbm %s933_s14, 512  ;;  %s673_s17 = scalar_lea.hbm %s978_s1, 2048 }
 0x1d6   : > { %p670_p3 = scmp.ne.s32.totalorder %s933_s14, %s669_s24  ;;  %p674_p0 = scmp.lt.u32.totalorder %s933_s14, %s978_s1 }
 0x1d7   : > { %p675_p2 = scmp.lt.u32.totalorder %s673_s17, %s669_s24  ;;  %p677_p6 = scmp.lt.u32.totalorder %s669_s24, %s933_s14 }
 0x1d8   : > { %p671_p4 = pnand %p670_p3, %p985_p10 }
 0x1d9   : > { %p676_p7 = por %p675_p2, %p674_p0 }
 0x1da   : > { %p672_p5 = pneg %p671_p4 }
 0x1db   : > { %p678_p11 = por %p677_p6, %p676_p7 }
 0x1dd   : > { %p679_p12 = pnand %p678_p11, %p672_p5 }
 0x1df   : > { %682 = shalt.err (!%p679_p12)
}
 0x1e0   : > { %s733_s28 = smov 128   ;;  %s734_s29 = smov 8  }
 0x1e1   : > { %571 = dma.vmem_to_hbm [thread:$0]  (%p985_p10), %s927_s4, 512, %s933_s14, %s462_s10, %s733_s28, %s733_s28, %s734_s29  }
 0x1e2 PF: > { %p582_p8 = scmp.ge.s32.totalorder %s721_s9, 2  ;;  %s491_s2 = sand.u32 1, %s709_s6  }
 0x1e3   : > { %p986_p9 = scmp.ne.s32.totalorder %s983_s19, 0  ;;  %s492_s3 = scalar_lea.sflag [#allocation4], %s491_s2 }
 0x1e5   : > { %p578_p13 = pnand %p582_p8, %p986_p9 }
 0x1e7   : > { %704 = dma.done.wait (!%p578_p13), %s492_s3, 512  }
 0x1e8   : > { %706 = vsyncadd (!%p578_p13), %s492_s3, 4294966784  ;;  %p14_p1 = scmp.ge.s32.totalorder %s770_s12, 6   ;;  %s987_s6 = smov %s713_s7 }
 0x1e9   : > { %s988_s7 = smov %s717_s8  ;;  %s989_s8 = smov %s782_s15 }
 0x1ea   : > { %s990_s9 = smov %s770_s12  ;;  %16 = sbr.rel (!%p14_p1) target bundleno = 5 (0x5), region = 69 }
 0x1f1   :  { %497 = vsyncpa [#allocation3], 1 }
 0x1f2   :  { %499 = vsyncpa [#allocation3 + $0x1], 1 }
 0x1f3   :  { %500 = vsyncpa [#allocation4], 1 }
 0x1f4   :  { %502 = vsyncpa [#allocation4 + $0x1], 1 }

</bundles_post_ra>
